<compile_context>
chip_gen: v7x
topology: tpu7x:2x2x1
jax: 0.10.0
libtpu: 0.0.40
codegen_flags: <defaults>
</compile_context>

<pallas_src>
import functools

import jax
import jax.numpy as jnp
from jax.experimental import pallas as pl
from jax.experimental.pallas import tpu as pltpu


def _mha_flash_kernel(xq_ref, k_ref, v_ref,
                      wq_ref, bq_ref, wp_ref, bp_ref,
                      o_ref,
                      q_sc, m_sc, l_sc, acc_sc, ocat_sc,
                      *, num_heads, head_dim, emb_size):
    """One (batch, q-tile) pair; streams pre-projected K/V tiles along grid axis 2.

    xq_ref : (1, TQ, E)     bf16  query-side activations for this q tile
    k_ref  : (1, H, TKV, D) bf16  pre-projected keys for this KV step
    v_ref  : (1, H, TKV, D) bf16  pre-projected values for this KV step
    wq_ref : (E, E)         bf16  query projection (VMEM-resident)
    bq_ref : (1, E)         f32
    wp_ref : (E, E)         bf16  output projection (VMEM-resident)
    bp_ref : (1, E)         f32
    o_ref  : (1, TQ, E)
    q_sc   : (H, TQ, D)  bf16  scaled per-head queries (computed at kv step 0)
    m_sc   : (H, TQ, 1)  f32   online-softmax running max
    l_sc   : (H, TQ, 1)  f32   online-softmax running denominator
    acc_sc : (H, TQ, D)  f32   online-softmax numerator
    ocat_sc: (TQ, E)     f32   merged-head staging buffer for the output projection
    """
    kv = pl.program_id(2)
    inv_scale = 1.0 / (emb_size ** 0.5)   # module scales by sqrt(emb_size), not sqrt(head_dim)

    @pl.when(kv == 0)
    def _init():
        # Q projection: ONE E-wide (TQ,E)@(E,E) MXU matmul (full 256-wide MXU
        # occupancy), then a one-time per-q-tile head split via static lane slices.
        xq = xq_ref[0]                                                    # (TQ, E) bf16
        q = jnp.dot(xq, wq_ref[...], preferred_element_type=jnp.float32)  # (TQ, E) f32
        q = (q + bq_ref[...]) * inv_scale                                 # fold 1/sqrt(E) into q
        for h in range(num_heads):                                         # once per q-tile
            q_sc[h] = q[:, h * head_dim:(h + 1) * head_dim].astype(jnp.bfloat16)
        m_sc[...] = jnp.full_like(m_sc, -jnp.inf)
        l_sc[...] = jnp.zeros_like(l_sc)
        acc_sc[...] = jnp.zeros_like(acc_sc)

    k = k_ref[0]                                                           # (H, TKV, D) bf16
    v = v_ref[0]                                                           # (H, TKV, D) bf16

    # Batched-over-heads q @ k^T -> (H, TQ, TKV) f32 (no per-head Python loop).
    s = jnp.einsum('hqd,hkd->hqk', q_sc[...], k,
                   preferred_element_type=jnp.float32)

    m_prev = m_sc[...]                                                     # (H, TQ, 1)
    m_new = jnp.maximum(m_prev, jnp.max(s, axis=-1, keepdims=True))
    alpha = jnp.exp(m_prev - m_new)
    p = jnp.exp(s - m_new)
    # TODO(synk): att_drop (nn.Dropout) is identity in eval mode and mask=None in the
    # reference forward; neither dropout nor masking is implemented here.
    l_sc[...] = alpha * l_sc[...] + jnp.sum(p, axis=-1, keepdims=True)
    acc_sc[...] = alpha * acc_sc[...] + jnp.einsum(
        'hqk,hkd->hqd', p.astype(jnp.bfloat16), v,
        preferred_element_type=jnp.float32)
    m_sc[...] = m_new

    @pl.when(kv == pl.num_programs(2) - 1)
    def _finalize():
        # Normalize, merge heads into one (TQ, E) operand (one relayout per q-tile),
        # then a single E-wide output-projection matmul (full MXU contraction depth).
        o_heads = acc_sc[...] * pl.reciprocal(l_sc[...], approx=True)      # (H, TQ, D) f32
        for h in range(num_heads):
            ocat_sc[:, h * head_dim:(h + 1) * head_dim] = o_heads[h]
        out = jnp.dot(ocat_sc[...].astype(jnp.bfloat16), wp_ref[...],
                      preferred_element_type=jnp.float32)
        o_ref[0] = (out + bp_ref[...]).astype(o_ref.dtype)


def multi_head_attention(x, params, *, num_heads, tq=256, tkv=512):
    """x: (B, N, E) float32. params: torch-layout (out,in) weights and (E,) biases."""
    B, N, E = x.shape
    assert E % num_heads == 0
    H = num_heads
    D = E // H

    TQ = min(tq, N)
    TKV = min(tkv, N)
    assert N % TQ == 0 and N % TKV == 0

    # Physical VMEM of the current chip (v5e/v6e: 128 MiB, v7x: 64 MiB per TC).
    try:
        vmem_cap = int(pltpu.get_tpu_info().vmem_capacity_bytes)
    except Exception:
        vmem_cap = 64 * 1024 * 1024   # assume the tightest generation (v7x)

    # Keep both TensorCores busy on v7x: parallel grid axes are (B, N/TQ).
    while B * (N // TQ) < 2 and TQ % 16 == 0:
        TQ //= 2

    # Explicit VMEM budget: resident weights + scratch + double-buffered tiles.
    # (m/l scratch is costed at its lane-padded size H*TQ*128*4.)  Shrink TKV
    # (then TQ) until the budget fits ~80% of physical VMEM.
    def vmem_bytes(tq_, tkv_):
        pad = lambda n, m: -(-n // m) * m
        Dp, Ep = pad(D, 128), pad(E, 128)
        resident = 2 * E * Ep * 2 + 2 * Ep * 4                      # wq, wp (bf16), bq, bp (f32)
        stream = (2 * (tq_ * Ep * 2)                                # xq tile, double-buffered
                  + 2 * 2 * (H * tkv_ * Dp * 2)                     # k, v tiles, double-buffered
                  + 2 * (tq_ * Ep * 4))                             # out tile, double-buffered
        scratch = (H * tq_ * Dp * 2 + H * tq_ * Dp * 4              # q_sc, acc_sc
                   + 2 * H * tq_ * 128 * 4                          # m_sc, l_sc (lane-padded)
                   + tq_ * Ep * 4)                                  # ocat_sc
        return resident + stream + scratch

    budget = int(0.8 * vmem_cap)
    while vmem_bytes(TQ, TKV) > budget:
        if TKV > 128 and TKV % 2 == 0:
            TKV //= 2
        elif TQ > 128 and TQ % 2 == 0:
            TQ //= 2
        else:
            break
    # TODO(synk): for very large E (>= ~4096) the resident wq/wp alone exceed a v7x
    # 64 MiB budget; they would then need to be streamed / head-blocked instead.

    bf16 = lambda a: a.astype(jnp.bfloat16)

    # torch Linear computes x @ W.T + b.
    wq = bf16(params["wq"].T)                        # (E, E)
    wp = bf16(params["wp"].T)                        # (E, E)
    bq = params["bq"].reshape(1, E)
    bp = params["bp"].reshape(1, E)

    # Pre-project K and V ONCE (full-MXU E-wide matmuls done by XLA) instead of
    # re-projecting the same KV tile for every q-tile inside the kernel.
    def project_heads(w, b):
        y = jnp.einsum('bne,fe->bnf', bf16(x), bf16(w),
                       preferred_element_type=jnp.float32) + b       # (B, N, E) f32
        return bf16(y.reshape(B, N, H, D).transpose(0, 2, 1, 3))     # (B, H, N, D) bf16

    k_proj = project_heads(params["wk"], params["bk"])
    v_proj = project_heads(params["wv"], params["bv"])
    xq = bf16(x)

    kernel = functools.partial(_mha_flash_kernel, num_heads=H, head_dim=D, emb_size=E)

    # Grid-invariant weights/biases: whole-array resident in VMEM (no double buffering).
    resident = pl.BlockSpec(memory_space=pltpu.MemorySpace.VMEM)

    cost = pl.CostEstimate(
        flops=4 * B * N * E * E + 4 * B * N * N * E,
        transcendentals=B * H * N * N,
        bytes_accessed=(B * N * E * 2                         # xq (bf16)
                        + 2 * (N // TQ) * B * N * E * 2       # k/v streams (re-read per q-tile)
                        + 2 * E * E * 2 + 2 * E * 4           # resident weights / biases
                        + B * N * E * 4),                     # output
    )

    return pl.pallas_call(
        kernel,
        out_shape=jax.ShapeDtypeStruct((B, N, E), x.dtype),
        grid_spec=pltpu.PrefetchScalarGridSpec(
            num_scalar_prefetch=0,
            grid=(B, N // TQ, N // TKV),
            in_specs=[
                pl.BlockSpec((1, TQ, E), lambda b, qi, ki: (b, qi, 0)),         # x -> q tile
                pl.BlockSpec((1, H, TKV, D), lambda b, qi, ki: (b, 0, ki, 0)),  # K stream
                pl.BlockSpec((1, H, TKV, D), lambda b, qi, ki: (b, 0, ki, 0)),  # V stream
                resident, resident,    # wq, bq
                resident, resident,    # wp, bp
            ],
            out_specs=pl.BlockSpec((1, TQ, E), lambda b, qi, ki: (b, qi, 0)),
            scratch_shapes=[
                pltpu.VMEM((H, TQ, D), jnp.bfloat16),   # scaled per-head q
                pltpu.VMEM((H, TQ, 1), jnp.float32),    # running max
                pltpu.VMEM((H, TQ, 1), jnp.float32),    # running denom
                pltpu.VMEM((H, TQ, D), jnp.float32),    # numerator acc
                pltpu.VMEM((TQ, E), jnp.float32),       # merged-head staging for out proj
            ],
        ),
        compiler_params=pltpu.CompilerParams(
            dimension_semantics=("parallel", "parallel", "arbitrary"),
            # ~110 MiB on 128 MiB chips (v5e/v6e), ~54 MiB on 64 MiB v7x.
            vmem_limit_bytes=min(int(0.85 * vmem_cap), 110 * 1024 * 1024),
        ),
        cost_estimate=cost,
    )(xq, k_proj, v_proj, wq, bq, wp, bp)


def mha_reference(x, params, *, num_heads):
    """Pure-JAX reference mirroring the PyTorch forward (eval mode, mask=None)."""
    B, N, E = x.shape
    D = E // num_heads

    def lin(x, w, b):  # torch Linear: x @ W.T + b
        return x @ w.T + b

    q = lin(x, params["wq"], params["bq"]).reshape(B, N, num_heads, D).transpose(0, 2, 1, 3)
    k = lin(x, params["wk"], params["bk"]).reshape(B, N, num_heads, D).transpose(0, 2, 1, 3)
    v = lin(x, params["wv"], params["bv"]).reshape(B, N, num_heads, D).transpose(0, 2, 1, 3)

    energy = jnp.einsum("bhqd,bhkd->bhqk", q, k)
    att = jax.nn.softmax(energy / (E ** 0.5), axis=-1)
    out = jnp.einsum("bhal,bhlv->bhav", att, v)
    out = out.transpose(0, 2, 1, 3).reshape(B, N, E)
    return lin(out, params["wp"], params["bp"])


def init_params(key, emb_size):
    """Deterministic init, roughly matching nn.Linear's uniform(-1/sqrt(E), 1/sqrt(E))."""
    bound = 1.0 / (emb_size ** 0.5)
    keys = jax.random.split(key, 8)
    mk_w = lambda k: jax.random.uniform(k, (emb_size, emb_size), jnp.float32, -bound, bound)
    mk_b = lambda k: jax.random.uniform(k, (emb_size,), jnp.float32, -bound, bound)
    return {
        "wq": mk_w(keys[0]), "bq": mk_b(keys[1]),
        "wk": mk_w(keys[2]), "bk": mk_b(keys[3]),
        "wv": mk_w(keys[4]), "bv": mk_b(keys[5]),
        "wp": mk_w(keys[6]), "bp": mk_b(keys[7]),
    }


if __name__ == "__main__":
    B, N, E, H = 2, 8, 32, 4

    key = jax.random.PRNGKey(0)
    kx, kp = jax.random.split(key)
    x = jax.random.normal(kx, (B, N, E), jnp.float32)
    params = init_params(kp, E)

    out = jax.block_until_ready(multi_head_attention(x, params, num_heads=H))
    ref = mha_reference(x, params, num_heads=H)

    assert out.shape == (B, N, E)
    max_err = jnp.max(jnp.abs(out - ref))
    # bf16 MXU operands vs f32 reference -> relaxed tolerance.
    assert jnp.allclose(out, ref, atol=5e-2, rtol=5e-2), f"max abs err = {max_err}"

    print("KERNEL_OK")
</pallas_src>

<mosaic_0001>
module attributes {stable_mosaic.version = 11 : i64} {
  func.func @_mha_flash_kernel(%arg0: i32, %arg1: i32, %arg2: i32, %arg3: memref<1x8x32xbf16, #tpu.memory_space<vmem>>, %arg4: memref<1x4x8x8xbf16, #tpu.memory_space<vmem>>, %arg5: memref<1x4x8x8xbf16, #tpu.memory_space<vmem>>, %arg6: memref<32x32xbf16, #tpu.memory_space<vmem>>, %arg7: memref<1x32xf32, #tpu.memory_space<vmem>>, %arg8: memref<32x32xbf16, #tpu.memory_space<vmem>>, %arg9: memref<1x32xf32, #tpu.memory_space<vmem>>, %arg10: memref<1x8x32xf32, #tpu.memory_space<vmem>>, %arg11: memref<4x8x8xbf16, #tpu.memory_space<vmem>>, %arg12: memref<4x8x1xf32, #tpu.memory_space<vmem>>, %arg13: memref<4x8x1xf32, #tpu.memory_space<vmem>>, %arg14: memref<4x8x8xf32, #tpu.memory_space<vmem>>, %arg15: memref<8x32xf32, #tpu.memory_space<vmem>>) attributes {dimension_semantics = [#tpu.dimension_semantics<parallel>, #tpu.dimension_semantics<parallel>, #tpu.dimension_semantics<arbitrary>], iteration_bounds = array<i64: 2, 1, 1>, scalar_prefetch = 0 : i64, scratch_operands = 5 : i64, tpu.core_type = #tpu.core_type<tc>, window_params = [{transform_indices = @transform_0, window_bounds = array<i64: 1, 8, 32>}, {transform_indices = @transform_1, window_bounds = array<i64: 1, 4, 8, 8>}, {transform_indices = @transform_2, window_bounds = array<i64: 1, 4, 8, 8>}, {pipeline_mode = #tpu.pipeline_mode<synchronous>, transform_indices = @transform_3, window_bounds = array<i64: 32, 32>}, {pipeline_mode = #tpu.pipeline_mode<synchronous>, transform_indices = @transform_4, window_bounds = array<i64: 1, 32>}, {pipeline_mode = #tpu.pipeline_mode<synchronous>, transform_indices = @transform_5, window_bounds = array<i64: 32, 32>}, {pipeline_mode = #tpu.pipeline_mode<synchronous>, transform_indices = @transform_6, window_bounds = array<i64: 1, 32>}, {transform_indices = @transform_7, window_bounds = array<i64: 1, 8, 32>}]} {
    %c0_i32 = arith.constant 0 : i32
    %0 = arith.cmpi eq, %arg2, %c0_i32 : i32
    %1 = arith.extui %0 : i1 to i32
    %c0_i32_0 = arith.constant 0 : i32
    %2 = arith.cmpi ne, %1, %c0_i32_0 : i32
    scf.if %2 {
      %c0_34 = arith.constant 0 : index
      %c0_35 = arith.constant 0 : index
      %c0_36 = arith.constant 0 : index
      %35 = vector.load %arg3[%c0_34, %c0_35, %c0_36] : memref<1x8x32xbf16, #tpu.memory_space<vmem>>, vector<1x8x32xbf16>
      %36 = vector.shape_cast %35 : vector<1x8x32xbf16> to vector<8x32xbf16>
      %c0_37 = arith.constant 0 : index
      %c0_38 = arith.constant 0 : index
      %37 = vector.load %arg6[%c0_37, %c0_38] : memref<32x32xbf16, #tpu.memory_space<vmem>>, vector<32x32xbf16>
      %cst_39 = arith.constant dense<0.000000e+00> : vector<8x32xf32>
      %38 = tpu.matmul %36, %37, %cst_39 {dimension_numbers = #tpu.dot_dimension_numbers<[1], [0], [0], [1], [0, 0, 1, 1], [], []>} : vector<8x32xbf16>, vector<32x32xbf16>, vector<8x32xf32> -> vector<8x32xf32>
      %c0_40 = arith.constant 0 : index
      %c0_41 = arith.constant 0 : index
      %39 = vector.load %arg7[%c0_40, %c0_41] : memref<1x32xf32, #tpu.memory_space<vmem>>, vector<1x32xf32>
      %40 = vector.broadcast %39 : vector<1x32xf32> to vector<8x32xf32>
      %41 = arith.addf %38, %40 : vector<8x32xf32>
      %cst_42 = arith.constant 0.176776692 : f32
      %42 = vector.broadcast %cst_42 : f32 to vector<8x32xf32>
      %43 = arith.mulf %41, %42 : vector<8x32xf32>
      %44 = vector.extract_strided_slice %43 {offsets = [0, 0], sizes = [8, 8], strides = [1, 1]} : vector<8x32xf32> to vector<8x8xf32>
      %45 = arith.truncf %44 : vector<8x8xf32> to vector<8x8xbf16>
      %c0_43 = arith.constant 0 : index
      %c0_44 = arith.constant 0 : index
      %c0_45 = arith.constant 0 : index
      %46 = vector.load %arg11[%c0_43, %c0_44, %c0_45] : memref<4x8x8xbf16, #tpu.memory_space<vmem>>, vector<1x8x8xbf16>
      %47 = vector.shape_cast %46 : vector<1x8x8xbf16> to vector<8x8xbf16>
      %48 = vector.shape_cast %45 : vector<8x8xbf16> to vector<1x8x8xbf16>
      tpu.vector_store %arg11[%c0_43, %c0_44, %c0_45], %48 {strides = array<i32>} : memref<4x8x8xbf16, #tpu.memory_space<vmem>>, vector<1x8x8xbf16>,
      %49 = vector.extract_strided_slice %43 {offsets = [0, 8], sizes = [8, 8], strides = [1, 1]} : vector<8x32xf32> to vector<8x8xf32>
      %50 = arith.truncf %49 : vector<8x8xf32> to vector<8x8xbf16>
      %c1 = arith.constant 1 : index
      %c0_46 = arith.constant 0 : index
      %c0_47 = arith.constant 0 : index
      %51 = vector.load %arg11[%c1, %c0_46, %c0_47] : memref<4x8x8xbf16, #tpu.memory_space<vmem>>, vector<1x8x8xbf16>
      %52 = vector.shape_cast %51 : vector<1x8x8xbf16> to vector<8x8xbf16>
      %53 = vector.shape_cast %50 : vector<8x8xbf16> to vector<1x8x8xbf16>
      tpu.vector_store %arg11[%c1, %c0_46, %c0_47], %53 {strides = array<i32>} : memref<4x8x8xbf16, #tpu.memory_space<vmem>>, vector<1x8x8xbf16>,
      %54 = vector.extract_strided_slice %43 {offsets = [0, 16], sizes = [8, 8], strides = [1, 1]} : vector<8x32xf32> to vector<8x8xf32>
      %55 = arith.truncf %54 : vector<8x8xf32> to vector<8x8xbf16>
      %c2 = arith.constant 2 : index
      %c0_48 = arith.constant 0 : index
      %c0_49 = arith.constant 0 : index
      %56 = vector.load %arg11[%c2, %c0_48, %c0_49] : memref<4x8x8xbf16, #tpu.memory_space<vmem>>, vector<1x8x8xbf16>
      %57 = vector.shape_cast %56 : vector<1x8x8xbf16> to vector<8x8xbf16>
      %58 = vector.shape_cast %55 : vector<8x8xbf16> to vector<1x8x8xbf16>
      tpu.vector_store %arg11[%c2, %c0_48, %c0_49], %58 {strides = array<i32>} : memref<4x8x8xbf16, #tpu.memory_space<vmem>>, vector<1x8x8xbf16>,
      %59 = vector.extract_strided_slice %43 {offsets = [0, 24], sizes = [8, 8], strides = [1, 1]} : vector<8x32xf32> to vector<8x8xf32>
      %60 = arith.truncf %59 : vector<8x8xf32> to vector<8x8xbf16>
      %c3 = arith.constant 3 : index
      %c0_50 = arith.constant 0 : index
      %c0_51 = arith.constant 0 : index
      %61 = vector.load %arg11[%c3, %c0_50, %c0_51] : memref<4x8x8xbf16, #tpu.memory_space<vmem>>, vector<1x8x8xbf16>
      %62 = vector.shape_cast %61 : vector<1x8x8xbf16> to vector<8x8xbf16>
      %63 = vector.shape_cast %60 : vector<8x8xbf16> to vector<1x8x8xbf16>
      tpu.vector_store %arg11[%c3, %c0_50, %c0_51], %63 {strides = array<i32>} : memref<4x8x8xbf16, #tpu.memory_space<vmem>>, vector<1x8x8xbf16>,
      %cst_52 = arith.constant 0xFF800000 : f32
      %64 = vector.broadcast %cst_52 : f32 to vector<4x8x1xf32>
      %c0_53 = arith.constant 0 : index
      %c0_54 = arith.constant 0 : index
      %c0_55 = arith.constant 0 : index
      %65 = vector.load %arg12[%c0_53, %c0_54, %c0_55] : memref<4x8x1xf32, #tpu.memory_space<vmem>>, vector<4x8x1xf32>
      tpu.vector_store %arg12[%c0_53, %c0_54, %c0_55], %64 {strides = array<i32>} : memref<4x8x1xf32, #tpu.memory_space<vmem>>, vector<4x8x1xf32>,
      %cst_56 = arith.constant 0.000000e+00 : f32
      %66 = vector.broadcast %cst_56 : f32 to vector<4x8x1xf32>
      %c0_57 = arith.constant 0 : index
      %c0_58 = arith.constant 0 : index
      %c0_59 = arith.constant 0 : index
      %67 = vector.load %arg13[%c0_57, %c0_58, %c0_59] : memref<4x8x1xf32, #tpu.memory_space<vmem>>, vector<4x8x1xf32>
      tpu.vector_store %arg13[%c0_57, %c0_58, %c0_59], %66 {strides = array<i32>} : memref<4x8x1xf32, #tpu.memory_space<vmem>>, vector<4x8x1xf32>,
      %cst_60 = arith.constant 0.000000e+00 : f32
      %68 = vector.broadcast %cst_60 : f32 to vector<4x8x8xf32>
      %c0_61 = arith.constant 0 : index
      %c0_62 = arith.constant 0 : index
      %c0_63 = arith.constant 0 : index
      %69 = vector.load %arg14[%c0_61, %c0_62, %c0_63] : memref<4x8x8xf32, #tpu.memory_space<vmem>>, vector<4x8x8xf32>
      tpu.vector_store %arg14[%c0_61, %c0_62, %c0_63], %68 {strides = array<i32>} : memref<4x8x8xf32, #tpu.memory_space<vmem>>, vector<4x8x8xf32>,
    } else {
    }
    %c0 = arith.constant 0 : index
    %c0_1 = arith.constant 0 : index
    %c0_2 = arith.constant 0 : index
    %c0_3 = arith.constant 0 : index
    %3 = vector.load %arg4[%c0, %c0_1, %c0_2, %c0_3] : memref<1x4x8x8xbf16, #tpu.memory_space<vmem>>, vector<1x4x8x8xbf16>
    %4 = vector.shape_cast %3 : vector<1x4x8x8xbf16> to vector<4x8x8xbf16>
    %c0_4 = arith.constant 0 : index
    %c0_5 = arith.constant 0 : index
    %c0_6 = arith.constant 0 : index
    %c0_7 = arith.constant 0 : index
    %5 = vector.load %arg5[%c0_4, %c0_5, %c0_6, %c0_7] : memref<1x4x8x8xbf16, #tpu.memory_space<vmem>>, vector<1x4x8x8xbf16>
    %6 = vector.shape_cast %5 : vector<1x4x8x8xbf16> to vector<4x8x8xbf16>
    %c0_8 = arith.constant 0 : index
    %c0_9 = arith.constant 0 : index
    %c0_10 = arith.constant 0 : index
    %7 = vector.load %arg11[%c0_8, %c0_9, %c0_10] : memref<4x8x8xbf16, #tpu.memory_space<vmem>>, vector<4x8x8xbf16>
    "tpu.trace_start"() <{level = 10 : i32, message = "hqd,hkd->hqk"}> : () -> ()
    %cst = arith.constant dense<0.000000e+00> : vector<4x8x8xf32>
    %8 = tpu.matmul %7, %4, %cst {dimension_numbers = #tpu.dot_dimension_numbers<[2], [2], [1], [1], [0, 0, 0, 1, 1, 1], [0], [0]>} : vector<4x8x8xbf16>, vector<4x8x8xbf16>, vector<4x8x8xf32> -> vector<4x8x8xf32>
    "tpu.trace_stop"() : () -> ()
    %c0_11 = arith.constant 0 : index
    %c0_12 = arith.constant 0 : index
    %c0_13 = arith.constant 0 : index
    %9 = vector.load %arg12[%c0_11, %c0_12, %c0_13] : memref<4x8x1xf32, #tpu.memory_space<vmem>>, vector<4x8x1xf32>
    %cst_14 = arith.constant dense<0xFF800000> : vector<4x8xf32>
    %10 = vector.multi_reduction <maximumf>, %8, %cst_14 [2] : vector<4x8x8xf32> to vector<4x8xf32>
    %11 = vector.shape_cast %10 : vector<4x8xf32> to vector<4x8x1xf32>
    %12 = arith.maximumf %9, %11 : vector<4x8x1xf32>
    %13 = arith.subf %9, %12 : vector<4x8x1xf32>
    %14 = math.exp %13 : vector<4x8x1xf32>
    %15 = vector.broadcast %12 : vector<4x8x1xf32> to vector<4x8x8xf32>
    %16 = arith.subf %8, %15 : vector<4x8x8xf32>
    %17 = math.exp %16 : vector<4x8x8xf32>
    %c0_15 = arith.constant 0 : index
    %c0_16 = arith.constant 0 : index
    %c0_17 = arith.constant 0 : index
    %18 = vector.load %arg13[%c0_15, %c0_16, %c0_17] : memref<4x8x1xf32, #tpu.memory_space<vmem>>, vector<4x8x1xf32>
    %19 = arith.mulf %14, %18 : vector<4x8x1xf32>
    %cst_18 = arith.constant dense<0.000000e+00> : vector<4x8xf32>
    %20 = vector.multi_reduction <add>, %17, %cst_18 [2] : vector<4x8x8xf32> to vector<4x8xf32>
    %21 = vector.shape_cast %20 : vector<4x8xf32> to vector<4x8x1xf32>
    %22 = arith.addf %19, %21 : vector<4x8x1xf32>
    %c0_19 = arith.constant 0 : index
    %c0_20 = arith.constant 0 : index
    %c0_21 = arith.constant 0 : index
    %23 = vector.load %arg13[%c0_19, %c0_20, %c0_21] : memref<4x8x1xf32, #tpu.memory_space<vmem>>, vector<4x8x1xf32>
    tpu.vector_store %arg13[%c0_19, %c0_20, %c0_21], %22 {strides = array<i32>} : memref<4x8x1xf32, #tpu.memory_space<vmem>>, vector<4x8x1xf32>,
    %c0_22 = arith.constant 0 : index
    %c0_23 = arith.constant 0 : index
    %c0_24 = arith.constant 0 : index
    %24 = vector.load %arg14[%c0_22, %c0_23, %c0_24] : memref<4x8x8xf32, #tpu.memory_space<vmem>>, vector<4x8x8xf32>
    %25 = vector.broadcast %14 : vector<4x8x1xf32> to vector<4x8x8xf32>
    %26 = arith.mulf %25, %24 : vector<4x8x8xf32>
    %27 = arith.truncf %17 : vector<4x8x8xf32> to vector<4x8x8xbf16>
    "tpu.trace_start"() <{level = 10 : i32, message = "hqk,hkd->hqd"}> : () -> ()
    %cst_25 = arith.constant dense<0.000000e+00> : vector<4x8x8xf32>
    %28 = tpu.matmul %27, %6, %cst_25 {dimension_numbers = #tpu.dot_dimension_numbers<[2], [1], [1], [2], [0, 0, 0, 1, 1, 2], [0], [0]>} : vector<4x8x8xbf16>, vector<4x8x8xbf16>, vector<4x8x8xf32> -> vector<4x8x8xf32>
    "tpu.trace_stop"() : () -> ()
    %29 = arith.addf %26, %28 : vector<4x8x8xf32>
    %c0_26 = arith.constant 0 : index
    %c0_27 = arith.constant 0 : index
    %c0_28 = arith.constant 0 : index
    %30 = vector.load %arg14[%c0_26, %c0_27, %c0_28] : memref<4x8x8xf32, #tpu.memory_space<vmem>>, vector<4x8x8xf32>
    tpu.vector_store %arg14[%c0_26, %c0_27, %c0_28], %29 {strides = array<i32>} : memref<4x8x8xf32, #tpu.memory_space<vmem>>, vector<4x8x8xf32>,
    %c0_29 = arith.constant 0 : index
    %c0_30 = arith.constant 0 : index
    %c0_31 = arith.constant 0 : index
    %31 = vector.load %arg12[%c0_29, %c0_30, %c0_31] : memref<4x8x1xf32, #tpu.memory_space<vmem>>, vector<4x8x1xf32>
    tpu.vector_store %arg12[%c0_29, %c0_30, %c0_31], %12 {strides = array<i32>} : memref<4x8x1xf32, #tpu.memory_space<vmem>>, vector<4x8x1xf32>,
    %c0_i32_32 = arith.constant 0 : i32
    %32 = arith.cmpi eq, %arg2, %c0_i32_32 : i32
    %33 = arith.extui %32 : i1 to i32
    %c0_i32_33 = arith.constant 0 : i32
    %34 = arith.cmpi ne, %33, %c0_i32_33 : i32
    scf.if %34 {
      %c0_34 = arith.constant 0 : index
      %c0_35 = arith.constant 0 : index
      %c0_36 = arith.constant 0 : index
      %35 = vector.load %arg14[%c0_34, %c0_35, %c0_36] : memref<4x8x8xf32, #tpu.memory_space<vmem>>, vector<4x8x8xf32>
      %c0_37 = arith.constant 0 : index
      %c0_38 = arith.constant 0 : index
      %c0_39 = arith.constant 0 : index
      %36 = vector.load %arg13[%c0_37, %c0_38, %c0_39] : memref<4x8x1xf32, #tpu.memory_space<vmem>>, vector<4x8x1xf32>
      %37 = tpu.reciprocal %36 {approx = true} : vector<4x8x1xf32> -> vector<4x8x1xf32>
      %38 = vector.broadcast %37 : vector<4x8x1xf32> to vector<4x8x8xf32>
      %39 = arith.mulf %35, %38 : vector<4x8x8xf32>
      %40 = vector.extract_strided_slice %39 {offsets = [0, 0, 0], sizes = [1, 8, 8], strides = [1, 1, 1]} : vector<4x8x8xf32> to vector<1x8x8xf32>
      %41 = vector.shape_cast %40 : vector<1x8x8xf32> to vector<8x8xf32>
      %c0_40 = arith.constant 0 : index
      %c0_41 = arith.constant 0 : index
      %42 = vector.load %arg15[%c0_40, %c0_41] : memref<8x32xf32, #tpu.memory_space<vmem>>, vector<8x8xf32>
      tpu.vector_store %arg15[%c0_40, %c0_41], %41 {strides = array<i32>} : memref<8x32xf32, #tpu.memory_space<vmem>>, vector<8x8xf32>,
      %43 = vector.extract_strided_slice %39 {offsets = [1, 0, 0], sizes = [1, 8, 8], strides = [1, 1, 1]} : vector<4x8x8xf32> to vector<1x8x8xf32>
      %44 = vector.shape_cast %43 : vector<1x8x8xf32> to vector<8x8xf32>
      %c0_42 = arith.constant 0 : index
      %c8 = arith.constant 8 : index
      %45 = vector.load %arg15[%c0_42, %c8] : memref<8x32xf32, #tpu.memory_space<vmem>>, vector<8x8xf32>
      tpu.vector_store %arg15[%c0_42, %c8], %44 {strides = array<i32>} : memref<8x32xf32, #tpu.memory_space<vmem>>, vector<8x8xf32>,
      %46 = vector.extract_strided_slice %39 {offsets = [2, 0, 0], sizes = [1, 8, 8], strides = [1, 1, 1]} : vector<4x8x8xf32> to vector<1x8x8xf32>
      %47 = vector.shape_cast %46 : vector<1x8x8xf32> to vector<8x8xf32>
      %c0_43 = arith.constant 0 : index
      %c16 = arith.constant 16 : index
      %48 = vector.load %arg15[%c0_43, %c16] : memref<8x32xf32, #tpu.memory_space<vmem>>, vector<8x8xf32>
      tpu.vector_store %arg15[%c0_43, %c16], %47 {strides = array<i32>} : memref<8x32xf32, #tpu.memory_space<vmem>>, vector<8x8xf32>,
      %49 = vector.extract_strided_slice %39 {offsets = [3, 0, 0], sizes = [1, 8, 8], strides = [1, 1, 1]} : vector<4x8x8xf32> to vector<1x8x8xf32>
      %50 = vector.shape_cast %49 : vector<1x8x8xf32> to vector<8x8xf32>
      %c0_44 = arith.constant 0 : index
      %c24 = arith.constant 24 : index
      %51 = vector.load %arg15[%c0_44, %c24] : memref<8x32xf32, #tpu.memory_space<vmem>>, vector<8x8xf32>
      tpu.vector_store %arg15[%c0_44, %c24], %50 {strides = array<i32>} : memref<8x32xf32, #tpu.memory_space<vmem>>, vector<8x8xf32>,
      %c0_45 = arith.constant 0 : index
      %c0_46 = arith.constant 0 : index
      %52 = vector.load %arg15[%c0_45, %c0_46] : memref<8x32xf32, #tpu.memory_space<vmem>>, vector<8x32xf32>
      %53 = arith.truncf %52 : vector<8x32xf32> to vector<8x32xbf16>
      %c0_47 = arith.constant 0 : index
      %c0_48 = arith.constant 0 : index
      %54 = vector.load %arg8[%c0_47, %c0_48] : memref<32x32xbf16, #tpu.memory_space<vmem>>, vector<32x32xbf16>
      %cst_49 = arith.constant dense<0.000000e+00> : vector<8x32xf32>
      %55 = tpu.matmul %53, %54, %cst_49 {dimension_numbers = #tpu.dot_dimension_numbers<[1], [0], [0], [1], [0, 0, 1, 1], [], []>} : vector<8x32xbf16>, vector<32x32xbf16>, vector<8x32xf32> -> vector<8x32xf32>
      %c0_50 = arith.constant 0 : index
      %c0_51 = arith.constant 0 : index
      %56 = vector.load %arg9[%c0_50, %c0_51] : memref<1x32xf32, #tpu.memory_space<vmem>>, vector<1x32xf32>
      %57 = vector.broadcast %56 : vector<1x32xf32> to vector<8x32xf32>
      %58 = arith.addf %55, %57 : vector<8x32xf32>
      %c0_52 = arith.constant 0 : index
      %c0_53 = arith.constant 0 : index
      %c0_54 = arith.constant 0 : index
      %59 = vector.load %arg10[%c0_52, %c0_53, %c0_54] : memref<1x8x32xf32, #tpu.memory_space<vmem>>, vector<1x8x32xf32>
      %60 = vector.shape_cast %59 : vector<1x8x32xf32> to vector<8x32xf32>
      %61 = vector.shape_cast %58 : vector<8x32xf32> to vector<1x8x32xf32>
      tpu.vector_store %arg10[%c0_52, %c0_53, %c0_54], %61 {strides = array<i32>} : memref<1x8x32xf32, #tpu.memory_space<vmem>>, vector<1x8x32xf32>,
    } else {
    }
    return
  }
  func.func @transform_0(%arg0: i32, %arg1: i32, %arg2: i32) -> (i32, i32, i32) {
    %c0_i32 = arith.constant 0 : i32
    %c0_i32_0 = arith.constant 0 : i32
    return %arg0, %arg1, %c0_i32 : i32, i32, i32
  }
  func.func @transform_1(%arg0: i32, %arg1: i32, %arg2: i32) -> (i32, i32, i32, i32) {
    %c0_i32 = arith.constant 0 : i32
    %c0_i32_0 = arith.constant 0 : i32
    %c0_i32_1 = arith.constant 0 : i32
    return %arg0, %c0_i32, %arg2, %c0_i32_0 : i32, i32, i32, i32
  }
  func.func @transform_2(%arg0: i32, %arg1: i32, %arg2: i32) -> (i32, i32, i32, i32) {
    %c0_i32 = arith.constant 0 : i32
    %c0_i32_0 = arith.constant 0 : i32
    %c0_i32_1 = arith.constant 0 : i32
    return %arg0, %c0_i32, %arg2, %c0_i32_0 : i32, i32, i32, i32
  }
  func.func @transform_3(%arg0: i32, %arg1: i32, %arg2: i32) -> (i32, i32) {
    %c0_i32 = arith.constant 0 : i32
    %c0_i32_0 = arith.constant 0 : i32
    %c0_i32_1 = arith.constant 0 : i32
    return %c0_i32, %c0_i32_0 : i32, i32
  }
  func.func @transform_4(%arg0: i32, %arg1: i32, %arg2: i32) -> (i32, i32) {
    %c0_i32 = arith.constant 0 : i32
    %c0_i32_0 = arith.constant 0 : i32
    %c0_i32_1 = arith.constant 0 : i32
    return %c0_i32, %c0_i32_0 : i32, i32
  }
  func.func @transform_5(%arg0: i32, %arg1: i32, %arg2: i32) -> (i32, i32) {
    %c0_i32 = arith.constant 0 : i32
    %c0_i32_0 = arith.constant 0 : i32
    %c0_i32_1 = arith.constant 0 : i32
    return %c0_i32, %c0_i32_0 : i32, i32
  }
  func.func @transform_6(%arg0: i32, %arg1: i32, %arg2: i32) -> (i32, i32) {
    %c0_i32 = arith.constant 0 : i32
    %c0_i32_0 = arith.constant 0 : i32
    %c0_i32_1 = arith.constant 0 : i32
    return %c0_i32, %c0_i32_0 : i32, i32
  }
  func.func @transform_7(%arg0: i32, %arg1: i32, %arg2: i32) -> (i32, i32, i32) {
    %c0_i32 = arith.constant 0 : i32
    %c0_i32_0 = arith.constant 0 : i32
    return %arg0, %arg1, %c0_i32 : i32, i32, i32
  }
}

</mosaic_0001>

<bundles_post_ra>
// kernel: tpu_custom_call.1
= control target key start
LH: loop header
LB: loop body
LE: loop exit
PB: predicated region body
PF: predicated region fallthrough
CT: control target
= control target key end

     0   :  { %s2319_s0 = inlined_call_operand.hbm [shape: bf16[2,8,32], index: 0, kind: input, shape index: {}]   ;;  %s2320_s1 = inlined_call_operand.hbm [shape: bf16[2,4,8,8], index: 1, kind: input, shape index: {}]   ;;  %s2321_s2 = inlined_call_operand.hbm [shape: bf16[2,4,8,8], index: 2, kind: input, shape index: {}]   ;;  %s2322_s3 = inlined_call_operand.hbm [shape: bf16[32,32], index: 3, kind: input, shape index: {}]   ;;  %s2323_s4 = inlined_call_operand.vmem [shape: f32[1,32], index: 4, kind: input, shape index: {}]   ;;  %s2324_s5 = inlined_call_operand.vmem [shape: bf16[32,32], index: 5, kind: input, shape index: {}]   ;;  %s2325_s6 = inlined_call_operand.vmem [shape: f32[1,32], index: 6, kind: input, shape index: {}]   ;;  %s2326_s7 = inlined_call_operand.hbm [shape: f32[2,8,32], index: 7, kind: output, shape index: {}]  }
   0x1   :  { %2350 = sst [smem:[#allocation28_spill]] %s2320_s1 }
   0x2   :  { %2351 = sst [smem:[#allocation29_spill]] %s2326_s7 }
   0x3   :  { %12 = vsyncpa [#allocation8], 0 }
   0x4   :  { %14 = vsyncpa [#allocation8 + $0x1], 0 }
   0x5   :  { %15 = vsyncpa [#allocation11], 0 }
   0x6   :  { %17 = vsyncpa [#allocation11 + $0x1], 0 }
   0x7   :  { %18 = vsyncpa [#allocation14], 0 }
   0x8   :  { %19 = vsyncpa [#allocation9], 0 }
   0x9   :  { %21 = vsyncpa [#allocation9 + $0x1], 0  ;;  %s1848_s24 = smov 0   ;;  %s1850_s25 = smov 0  }
   0xa   :  { %s1852_s26 = smov 0   ;;  %s1854_s27 = smov 0  }
   0xb   :  { %s1856_s28 = smov 0   ;;  %s1858_s29 = smov 0  }
   0xc LB: > { %2352 = sst [smem:[#allocation20_spill]] %s1769_s24  ;;  %s46_s30 = sadd.s32 1, %s1785_s28  ;;  %s1789_s29 = sphi %s1858_s29, %s27_s29   ;;  %s1785_s28 = sphi %s1856_s28, %s2388_s28   ;;  %s1781_s27 = sphi %s1854_s27, %s2387_s27   ;;  %s1777_s26 = sphi %s1852_s26, %s2386_s26   ;;  %s1773_s25 = sphi %s1850_s25, %s2390_s25   ;;  %s1769_s24 = sphi %s1848_s24, %s2389_s24  }
   0xd   : > { %2353 = sst [smem:[#allocation21_spill]] %s1777_s26  ;;  %s55_s8 = sadd.s32 1, %s1777_s26 }
   0xe   : > { %2354 = sst [smem:[#allocation22_spill]] %s1785_s28  ;;  %p48_p0 = scmp.ge.s32.totalorder %s46_s30, 2 }
   0xf   : > { %2355 = sst [smem:[#allocation23_spill]] %s1789_s29  ;;  %p2327_p1 = scmp.ne.s32.totalorder %s1777_s26, %s1773_s25 }
  0x10   : > { %p63_p2 = scmp.eq.s32.totalorder %s1789_s29, 0  ;;  %s2392_s30 = smov (%p48_p0, %s46_s30), 0 }
  0x11   : > { %2356 = sst [smem:[#allocation24_spill]] %s2392_s30  ;;  %s50_s9 = ssub.s32 %s1785_s28, %s2392_s30 }
  0x12   : > { %p64_p3 = por %p63_p2, %p2327_p1  ;;  %p53_p5 = scmp.eq.s32.totalorder %s50_s9, 0 }
  0x13   : > { %p1487_p6 = scmp.lt.s32.totalorder %s1789_s29, 2  ;;  %s1893_s10 = sand.u32 1, %s1777_s26  }
  0x14   : > { %s301_s11 = sand.u32 1, %s1789_s29   ;;  %s1334_s14 = sshll.u32 %s1893_s10, 4 }
  0x15   : > { %s1897_s12 = scalar_select %p53_p5, %s1777_s26, %s55_s8  }
  0x16   : > { %p1899_p7 = pnand %p1487_p6, %p64_p3  ;;  %s1367_s15 = sshll.u32 %s1785_s28, 8 }
  0x17   : > { %2357 = sst [smem:[#allocation25_spill]] %s1897_s12  ;;  %s2359_s1 = sld [smem:[#allocation28_spill]] }
  0x18   : > { %s2358_s13 = scalar_select %p1899_p7, 1, 0 }
  0x19   : > { %s305_s19 = scalar_lea.vmem [#allocation10], %s1334_s14  ;;  %s1916_s21 = scalar_lea.sflag [#allocation11], %s301_s11 }
  0x1a   : > { %s313_s20 = sshll.u32 %s305_s19, 4  ;;  %p1922_p9 = pneg %p1899_p7  ;;  %s1914_s20 = int_to_ptr.vmem [resolvable:$true] %s313_s20 }
  0x1c   : > { %s2360_s23 = scalar_select %p1922_p9, 1, 0 }
  0x1d   : > { %s1910_s18 = scalar_lea.hbm %s2359_s1, %s1367_s15  ;;  %s1586_s16 = scalar_lea.hbm %s2359_s1, 512 }
  0x1e   : > { %s1581_s22 = scalar_lea.hbm %s1910_s18, 256  ;;  %p1587_p12 = scmp.lt.u32.totalorder %s1910_s18, %s2359_s1 }
  0x1f   : > { %p1582_p8 = scmp.ne.s32.totalorder %s1910_s18, %s1581_s22  ;;  %p1588_p13 = scmp.lt.u32.totalorder %s1586_s16, %s1581_s22 }
  0x20   : > { %p1590_p2 = scmp.lt.u32.totalorder %s1581_s22, %s1910_s18 }
  0x21   : > { %p1584_p10 = pnand %p1922_p9, %p1582_p8  ;;  %p1589_p0 = por %p1588_p13, %p1587_p12 }
  0x23   : > { %p1585_p11 = pneg %p1584_p10  ;;  %p1591_p3 = por %p1590_p2, %p1589_p0 }
  0x25   : > { %p1592_p5 = pnand %p1591_p3, %p1585_p11 }
  0x27   : > { %1595 = shalt.err (!%p1592_p5)
}
  0x28   : > { %s1596_s11 = scalar_lea.vmem %s1914_s20, 256  ;;  %s1791_s8 = smov [#allocation10]  }
  0x29   : > { %p1597_p6 = scmp.ne.s32.totalorder %s1914_s20, %s1596_s11  ;;  %s1601_s9 = sshll.u32 %s1791_s8, 4  ;;  %s1602_s9 = int_to_ptr.vmem [resolvable:$false] %s1601_s9 }
  0x2a   : > { %s1603_s17 = scalar_lea.vmem %s1602_s9, 512  ;;  %p1604_p4 = scmp.lt.s32.totalorder %s1914_s20, %s1602_s9 }
  0x2b   : > { %p1599_p8 = pnand %p1597_p6, %p1922_p9  ;;  %p1605_p1 = scmp.lt.s32.totalorder %s1603_s17, %s1596_s11 }
  0x2d   : > { %p1600_p10 = pneg %p1599_p8  ;;  %p1606_p12 = por %p1605_p1, %p1604_p4 }
  0x2f   : > { %p1607_p13 = pnand %p1606_p12, %p1600_p10 }
  0x31   : > { %1610 = shalt.err (!%p1607_p13)
}
  0x32   : > { %s2329_s22 = smov 64   ;;  %s2331_s16 = smov 4  }
  0x33   : > { %1478 = dma.hbm_to_vmem [thread:$0]  (!%p1899_p7), %s1910_s18, 256, %s1914_s20, %s1916_s21, %s2329_s22, %s2329_s22, %s2331_s16  }
  0x34   : > { %s1954_s8 = scalar_lea.hbm %s2321_s2, %s1367_s15  ;;  %s327_s9 = scalar_lea.vmem [#allocation12], %s1334_s14 }
  0x35   : > { %s335_s17 = sshll.u32 %s327_s9, 4  ;;  %s1959_s1 = sadd.s32 4294967295, %s1789_s29   ;;  %s1989_s17 = int_to_ptr.vmem [resolvable:$true] %s335_s17 }
  0x36   : > { %s1328_s30 = sadd.s32 4294967294, %s1789_s29   ;;  %p68_p1 = scmp.ne.s32.totalorder %s1773_s25, %s1769_s24 }
  0x37   : > { %p2342_p4 = scmp.eq.s32.totalorder %s1959_s1, 0  ;;  %p234_p11 = scmp.eq.s32.totalorder %s1959_s1, 1 }
  0x38   : > { %p240_p0 = scmp.eq.s32.totalorder %s1328_s30, 1  ;;  %p1329_p2 = scmp.ge.s32.totalorder %s1789_s29, 1 }
  0x39   : > { %p1969_p3 = por %p2342_p4, %p68_p1  ;;  %p2362_p5 = scmp.ne.s32.totalorder %s1777_s26, %s1773_s25 }
  0x3a   : > { %p1980_p8 = por %p240_p0, %p68_p1  ;;  %p247_p10 = scmp.lt.s32.totalorder %s1789_s29, 3 }
  0x3b   : > { %s2361_s15 = scalar_select %p1969_p3, 1, 0 }
  0x3c   : > { %p1976_p6 = por %p234_p11, %p2362_p5  ;;  %p1985_p12 = pnand %p1329_p2, %p247_p10 }
  0x3d   : > { %s2365_s18 = scalar_select %p1980_p8, 1, 0 }
  0x3e   : > { %s2363_s14 = scalar_select %p1976_p6, 1, 0 }
  0x3f   : > { %2366 = sst [smem:[#allocation27_spill]] %s2365_s18  ;;  %s1794_s30 = smov [#allocation13]  }
  0x40   : > { %2364 = sst [smem:[#allocation26_spill]] %s2363_s14  ;;  %s259_s19 = sshll.u32 %s1794_s30, 4  ;;  %s1991_s19 = int_to_ptr.vmem [resolvable:$true] %s259_s19 }
  0x41   : > { %s2367_s20 = scalar_select %p1985_p12, 1, 0 }
  0x42   : > { %p1468_p13 = pneg %p1985_p12  ;;  %s1332_s11 = sshll.u32 %s1893_s10, 2 }
  0x43   : > { %s1333_s9 = sshll.u32 %s1785_s28, 6  ;;  %s286_s30 = scalar_lea.vmem [#allocation7], %s1332_s11 }
  0x44   : > { %p1999_p1 = pnand %p1468_p13, %p2342_p4  ;;  %s2006_s26 = scalar_lea.hbm %s2319_s0, %s1333_s9 }
  0x45   : > { %s294_s29 = sshll.u32 %s286_s30, 4  ;;  %s1611_s7 = scalar_lea.hbm %s2322_s3, 256  ;;  %s2008_s29 = int_to_ptr.vmem [resolvable:$true] %s294_s29 }
  0x46   : > { %p1612_p11 = scmp.ne.s32.totalorder %s2322_s3, %s1611_s7  ;;  %p1613_p0 = pneg %p1999_p1 }
  0x47   : > { %p1618_p10 = scmp.lt.u32.totalorder %s1611_s7, %s2322_s3 }
  0x48   : > { %p1614_p2 = pnand %p1613_p0, %p1612_p11 }
  0x4a   : > { %p1615_p5 = pneg %p1614_p2 }
  0x4c   : > { %p1620_p13 = pnand %p1618_p10, %p1615_p5 }
  0x4e   : > { %1623 = shalt.err (!%p1620_p13)
}
  0x4f   : > { %s1624_s11 = scalar_lea.vmem %s1991_s19, 256  ;;  %p1632_p3 = scmp.lt.s32.totalorder %s1991_s19, %s1991_s19 }
  0x50   : > { %p1625_p4 = scmp.ne.s32.totalorder %s1991_s19, %s1624_s11  ;;  %p1633_p12 = scmp.lt.s32.totalorder %s1624_s11, %s1624_s11 }
  0x52   : > { %p1627_p8 = pnand %p1625_p4, %p1613_p0  ;;  %p1634_p7 = por %p1633_p12, %p1632_p3 }
  0x54   : > { %p1628_p6 = pneg %p1627_p8 }
  0x56   : > { %p1635_p9 = pnand %p1634_p7, %p1628_p6 }
  0x58   : > { %1638 = shalt.err (!%p1635_p9)
}
  0x59   : > { %s2369_s24 = smov 4   ;;  %s2370_s28 = smov 64  }
  0x5a   : > { %1471 = dma.hbm_to_vmem [thread:$0]  (!%p1999_p1), %s2322_s3, 256, %s1991_s19, [#allocation14], %s2370_s28, %s2370_s28, %s2369_s24  }
  0x5b   : > { %s283_s18 = scalar_lea.sflag [#allocation8], %s1893_s10  ;;  %s1639_s9 = scalar_lea.hbm %s2006_s26, 64 }
  0x5c   : > { %p1640_p7 = scmp.ne.s32.totalorder %s2006_s26, %s1639_s9  ;;  %p2371_p9 = scmp.ne.s32.totalorder %s2360_s23, 0 }
  0x5d   : > { %s1644_s12 = scalar_lea.hbm %s2319_s0, 128  ;;  %p1645_p6 = scmp.lt.u32.totalorder %s2006_s26, %s2319_s0 }
  0x5e   : > { %p1642_p4 = pnand %p1640_p7, %p2371_p9  ;;  %p1646_p8 = scmp.lt.u32.totalorder %s1644_s12, %s1639_s9 }
  0x5f   : > { %p1648_p11 = scmp.lt.u32.totalorder %s1639_s9, %s2006_s26 }
  0x60   : > { %p1643_p3 = pneg %p1642_p4  ;;  %p1647_p12 = por %p1646_p8, %p1645_p6 }
  0x62   : > { %p1649_p0 = por %p1648_p11, %p1647_p12 }
  0x64   : > { %p1650_p2 = pnand %p1649_p0, %p1643_p3 }
  0x66   : > { %1653 = shalt.err (!%p1650_p2)
}
  0x67   : > { %s1654_s10 = scalar_lea.vmem %s2008_s29, 64  ;;  %s1795_s19 = smov [#allocation7]  }
  0x68   : > { %p1655_p1 = scmp.ne.s32.totalorder %s2008_s29, %s1654_s10  ;;  %s1659_s7 = sshll.u32 %s1795_s19, 4  ;;  %s1660_s7 = int_to_ptr.vmem [resolvable:$false] %s1659_s7 }
  0x69   : > { %s1661_s14 = scalar_lea.vmem %s1660_s7, 128  ;;  %p1662_p13 = scmp.lt.s32.totalorder %s2008_s29, %s1660_s7 }
  0x6a   : > { %p1657_p5 = pnand %p1655_p1, %p2371_p9  ;;  %p1663_p7 = scmp.lt.s32.totalorder %s1661_s14, %s1654_s10 }
  0x6c   : > { %p1658_p10 = pneg %p1657_p5  ;;  %p1664_p4 = por %p1663_p7, %p1662_p13 }
  0x6e   : > { %p1665_p6 = pnand %p1664_p4, %p1658_p10 }
  0x70   : > { %1668 = shalt.err (!%p1665_p6)
}
  0x71   : > { %p2372_p3 = scmp.ne.s32.totalorder %s2358_s13, 0  ;;  %s1669_s9 = scalar_lea.hbm %s1954_s8, 256 }
  0x72   : > { %p1670_p8 = scmp.ne.s32.totalorder %s1954_s8, %s1669_s9  ;;  %s1674_s12 = scalar_lea.hbm %s2321_s2, 512 }
  0x73   : > { %1475 = dma.hbm_to_vmem [thread:$0]  (!%p2372_p3), %s2006_s26, 64, %s2008_s29, %s283_s18  }
  0x74   : > { %p1672_p12 = pnand %p1670_p8, %p2371_p9  ;;  %p1675_p0 = scmp.lt.u32.totalorder %s1954_s8, %s2321_s2 }
  0x75   : > { %p1676_p2 = scmp.lt.u32.totalorder %s1674_s12, %s1669_s9  ;;  %p1678_p5 = scmp.lt.u32.totalorder %s1669_s9, %s1954_s8 }
  0x76   : > { %p1673_p11 = pneg %p1672_p12 }
  0x77   : > { %p1677_p1 = por %p1676_p2, %p1675_p0 }
  0x79   : > { %p1679_p10 = por %p1678_p5, %p1677_p1 }
  0x7b   : > { %p1680_p13 = pnand %p1679_p10, %p1673_p11 }
  0x7d   : > { %1683 = shalt.err (!%p1680_p13)
}
  0x7e   : > { %s1684_s26 = scalar_lea.vmem %s1989_s17, 256  ;;  %s1796_s29 = smov [#allocation12]  }
  0x7f   : > { %p1685_p7 = scmp.ne.s32.totalorder %s1989_s17, %s1684_s26  ;;  %s1689_s18 = sshll.u32 %s1796_s29, 4  ;;  %s1690_s18 = int_to_ptr.vmem [resolvable:$false] %s1689_s18 }
  0x80   : > { %s1691_s10 = scalar_lea.vmem %s1690_s18, 512  ;;  %p1692_p8 = scmp.lt.s32.totalorder %s1989_s17, %s1690_s18 }
  0x81   : > { %p1687_p4 = pnand %p1685_p7, %p2371_p9  ;;  %p1693_p12 = scmp.lt.s32.totalorder %s1691_s10, %s1684_s26 }
  0x83   : > { %p1688_p6 = pneg %p1687_p4  ;;  %p1694_p0 = por %p1693_p12, %p1692_p8 }
  0x85   : > { %p1695_p2 = pnand %p1694_p0, %p1688_p6 }
  0x87   : > { %1698 = shalt.err (!%p1695_p2)
}
  0x88   : > { %1481 = dma.hbm_to_vmem [thread:$0]  (!%p2372_p3), %s1954_s8, 256, %s1989_s17, %s1916_s21, %s2370_s28, %s2370_s28, %s2369_s24  }
  0x89   : > { %p2373_p9 = scmp.ne.s32.totalorder %s2367_s20, 0 }
  0x8a   : > { %s2084_s23 = sand.u32 (!%p2373_p9), 1, %s1773_s25   ;;  %p2374_p11 = scmp.ne.s32.totalorder (!%p2373_p9), %s2361_s15, 0 }
  0x8b   : > { %347 = sbr.rel (%p2373_p9) target bundleno = 1659 (0x67b), region = 48  ;;  %s1341_s19 = sshll.u32 (!%p2373_p9), %s2084_s23, 2 }
  0x8c   : > { %s350_s7 = scalar_lea.sflag (!%p2373_p9), [#allocation8], %s2084_s23  ;;  %s353_s14 = scalar_lea.vmem (!%p2373_p9), [#allocation7], %s1341_s19 }
  0x92   : > { %1752 = dma.done.wait (%p2374_p11), %s350_s7, 64  }
  0x93   : > { %1754 = vsyncadd (%p2374_p11), %s350_s7, 4294967232  ;;  %s358_s13 = sand.u32 1, %s1959_s1   ;;  %s1342_s21 = sshll.u32 %s2084_s23, 4 }
  0x94   : > { %s359_s8 = scalar_lea.sflag [#allocation11], %s358_s13  ;;  %s2094_s17 = scalar_lea.vmem [#allocation10], %s1342_s21 }
  0x95   : > { %1756 = dma.done.wait (%p2374_p11), %s359_s8, 512  }
  0x96   : > { %1758 = vsyncadd (%p2374_p11), %s359_s8, 4294966784  ;;  %s2100_s20 = scalar_lea.vmem [#allocation12], %s1342_s21  ;;  %p2375_p3 = scmp.eq.s32.totalorder %s1959_s1, 0 }
  0x98   : > { %1760 = dma.done.wait (%p2375_p3), [#allocation14], 256   ;;  %p2376_p1 = pmov %p2375_p3 }
  0x99   : > { %v1797_v0 = vmov 0.0   ;;  %vm1798_vm0 = vmmov 0   ;;  %v1553_v1 = vld [vmem:[#allocation13] sm:$0xff]   ;;  %v1554_v2 = vld [vmem:[#allocation13 + $0x8] sm:$0xff]   ;;  %v421_v3 = vld [vmem:[%s353_s14] sm:$0xf] }
  0x9a   : > { %1762 = vsyncadd (%p2376_p1), [#allocation14], 4294967040  ;;  %1392 = vmatprep.subr.bf16.mxu0 %v1797_v0  ;;  %1396 = vmatprep.mubr.msk.bf16.mxu0 %vm1798_vm0, %v1797_v0  ;;  %vm445_vm1 = vcmask 261120   ;;  %vm520_vm2 = vcmask 64512   ;;  %v525_v4 = vld [vmem:[%s2094_s17] sm:$0xf] }
  0x9b   : > { %1400 = vmatprep.subr.bf16.mxu1 %v1797_v0  ;;  %1402 = vmatprep.mubr.msk.bf16.mxu1 %vm1798_vm0, %v1797_v0  ;;  %v542_v5 = vsel %vm520_vm2, %v525_v4, 0  ;;  %521 = vst.msk [vmem:[#allocation5] sm:$0xff] %vm520_vm2, %v1797_v0  ;;  %522 = vst.msk [vmem:[#allocation5 + $0x8] sm:$0xff] %vm520_vm2, %v1797_v0  ;;  %v526_v6 = vld [vmem:[%s2094_s17 + $0x4] sm:$0xf]  ;;  %vm491_vm3 = vcmask 60416  }
  0x9c   : > { %1393 = vmatpush3.bf16.msra.mxu0 %v1553_v1  ;;  %523 = vst.msk [vmem:[#allocation5 + $0x10] sm:$0xff] %vm520_vm2, %v1797_v0  ;;  %524 = vst.msk [vmem:[#allocation5 + $0x18] sm:$0xff] %vm520_vm2, %v1797_v0  ;;  %1401 = vmatpush3.bf16.xpose.msra.mxu1 %v542_v5  ;;  %v588_v7 = vsel %vm520_vm2, %v526_v6, 0  ;;  %v1346_v8 = vld [vmem:[%s2323_s4] ss:$0 sm:$0xff]  ;;  %s1799_s24 = smov 104  }
  0x9d   : > { %1394 = vmatprep.subr.bf16.mxu0 %v1797_v0  ;;  %1412 = vmatprep.subr.bf16.mxu1 %v1797_v0  ;;  %s1800_s28 = smov 120   ;;  %v527_v16 = vld [vmem:[%s2094_s17 + $0x8] sm:$0xf]  ;;  %s1801_s9 = smov 112   ;;  %v528_v22 = vld [vmem:[%s2094_s17 + $0xc] sm:$0xf] }
  0x9e   : > { %v634_v17 = vsel %vm520_vm2, %v527_v16, 0  ;;  %v680_v23 = vsel %vm520_vm2, %v528_v22, 0  ;;  %vm511_vm4 = vcmask 7168   ;;  %v1802_v27 = vmov -inf   ;;  %v529_v53 = vld [vmem:[%s2100_s20] sm:$0xf] }
  0x9f   : > { %512 = vst.msk [vmem:[#allocation3] sm:$0xff] %vm511_vm4, %v1802_v27  ;;  %513 = vst.msk [vmem:[#allocation3 + $0x8] sm:$0xff] %vm511_vm4, %v1802_v27  ;;  %v1803_v33 = vmov 0   ;;  %vm850_vm5 = vcmask 1043456   ;;  %v530_v5 = vld [vmem:[%s2100_s20 + $0x4] sm:$0xf] }
  0xa0   : > { %1395 = vmatpush3.bf16.msra.mxu0 %v1554_v2  ;;  %514 = vst.msk [vmem:[#allocation3 + $0x10] sm:$0xff] %vm511_vm4, %v1802_v27  ;;  %515 = vst.msk [vmem:[#allocation3 + $0x18] sm:$0xff] %vm511_vm4, %v1802_v27  ;;  %1551 = vset.pattern.permute.xlu0 %v1803_v33  ;;  %v852_v54 = vsel %vm850_vm5, %v529_v53, 0  ;;  %v532_v22 = vld [vmem:[%s2100_s20 + $0xc] sm:$0xf]  ;;  %s1804_s11 = smov 8  }
  0xa1   : > { %1406 = vmatprep.subr.bf16.mxu0 %v1797_v0  ;;  %516 = vst.msk [vmem:[#allocation4] sm:$0xff] %vm511_vm4, %v1797_v0  ;;  %517 = vst.msk [vmem:[#allocation4 + $0x8] sm:$0xff] %vm511_vm4, %v1797_v0  ;;  %1552 = vset.pattern.permute.xlu1 %v1803_v33  ;;  %s1805_s26 = smov 16   ;;  %s1806_s29 = smov 24   ;;  %vm1088_vm6 = vcmask 130112   ;;  %vm1094_vm7 = vcmask 195712  }
  0xa2   : > { %518 = vst.msk [vmem:[#allocation4 + $0x10] sm:$0xff] %vm511_vm4, %v1797_v0  ;;  %519 = vst.msk [vmem:[#allocation4 + $0x18] sm:$0xff] %vm511_vm4, %v1797_v0  ;;  %vm1100_vm8 = vcmask 261312   ;;  %s1345_s18 = sshll.u32 %s2084_s23, 3  ;;  %s2377_s7 = sld [smem:[#allocation26_spill]] }
  0xa3   : > { %1397 = vmatmul.mubr.msk.bf16.vlgmr.msra.gmra.mrb[0].mxu0 %vm445_vm1, %v421_v3  ;;  %s1364_s14 = sshll.u32 %s1781_s27, 7  ;;  %s415_s13 = scalar_lea.vmem [#allocation15], %s1345_s18 }
  0xa4   : > { %1408 = vmatprep.mubr.msk.bf16.mxu0 %vm1798_vm0, %v1797_v0  ;;  %s1187_s21 = sshll.u32 %s415_s13, 4  ;;  %s1173_s27 = scalar_lea.sflag [#allocation9], %s2084_s23  ;;  %s2271_s21 = int_to_ptr.vmem [resolvable:$true] %s1187_s21 }
  0xa5   : > { %s1699_s15 = scalar_lea.vmem %s2271_s21, 128 }
  0xa6   : > { %v2178_v49 = vld [vmem:[#allocation3] sm:$0xff]  ;;  %v2191_v55 = vld [vmem:[#allocation3 + $0x8] sm:$0xff]  ;;  %p1700_p5 = scmp.ne.s32.totalorder %s2271_s21, %s1699_s15 }
  0xa7   : > { %v2196_v58 = vld [vmem:[#allocation3 + $0x10] sm:$0xff]  ;;  %v2204_v62 = vld [vmem:[#allocation3 + $0x18] sm:$0xff] }
  0xa8   : > { %p2379_p10 = scmp.ne.s32.totalorder %s2377_s7, 0 }
  0xa9   : > { %1407 = vmatpush3.bf16.xpose.msra.mxu0 %v588_v7  ;;  %v898_v7 = vsel %vm850_vm5, %v530_v5, 0 }
  0xaa   : > { %1418 = vmatprep.subr.bf16.mxu0 %v1797_v0  ;;  %p1701_p13 = pnand %p1700_p5, %p2379_p10 }
  0xac   : > { %p1702_p7 = pneg %p1701_p13 }
 0x176   : > { %v483_v9 = vpop.f32.mrb[0].mxu0 }
 0x177   : > { %v484_v10 = vadd.f32 %v1346_v8, %v483_v9  ;;  %v1398_v11 = vpop.f32.mrb[1].mxu0  ;;  %v531_v9 = vld [vmem:[%s2100_s20 + $0x8] sm:$0xf]  ;;  %s2378_s20 = sld [smem:[#allocation29_spill]] }
 0x178   : > { %v486_v12 = vpop.f32.mrb[2].mxu0 }
 0x179   : > { %v489_v13 = vmul.f32 0.17677669, %v484_v10  ;;  %v1399_v14 = vpop.f32.mrb[3].mxu0  ;;  %v944_v12 = vsel %vm850_vm5, %v531_v9, 0 }
 0x17b   : > { %v490_v15 = vpack.c.bf16 %v489_v13, %v489_v13 }
 0x17d   : > { %492 = vst.msk [vmem:[#allocation2] sm:$0xf] %vm491_vm3, %v490_v15  ;;  %506 = vrot.lane.b32.xlu1 %v490_v15, %s1799_s24  ;;  %496 = vrot.lane.b32.xlu0 %v490_v15, %s1800_s28  ;;  %s2269_s1 = scalar_lea.hbm %s2378_s20, %s1364_s14  ;;  %s1807_s24 = smov [#allocation15]  }
 0x17e   : > { %s1703_s28 = sshll.u32 %s1807_s24, 4  ;;  %s1704_s28 = int_to_ptr.vmem [resolvable:$false] %s1703_s28 }
 0x17f   : > { %p1706_p4 = scmp.lt.s32.totalorder %s2271_s21, %s1704_s28 }
 0x181   : > { %501 = vrot.lane.b32.xlu0 %v490_v15, %s1801_s9  ;;  %s1705_s9 = scalar_lea.vmem %s1704_s28, 256 }
 0x182   : > { %p1707_p6 = scmp.lt.s32.totalorder %s1705_s9, %s1699_s15 }
 0x184   : > { %v533_v18 = vld [vmem:[#allocation2] sm:$0xf]  ;;  %p1708_p8 = por %p1707_p6, %p1706_p4 }
 0x185   : > { %1403 = vmatmul.mubr.msk.bf16.vlgmr.msra.gmra.mrb[0].mxu1 %vm520_vm2, %v533_v18 }
 0x186   : > { %1413 = vmatpush3.bf16.xpose.msra.mxu1 %v634_v17  ;;  %1414 = vmatprep.mubr.msk.bf16.mxu1 %vm1798_vm0, %v1797_v0  ;;  %p1709_p12 = pnand %p1708_p8, %p1702_p7 }
 0x187   : > { %1424 = vmatprep.subr.bf16.mxu1 %v1797_v0 }
 0x1ef   : > { %v507_v19 = vpop.permute.xlu1 %506  ;;  %v497_v20 = vpop.permute.xlu0 %496 }
 0x1f0   : > { %510 = vst.msk [vmem:[#allocation2 + $0xc] sm:$0xf] %vm491_vm3, %v507_v19  ;;  %500 = vst.msk [vmem:[#allocation2 + $0x4] sm:$0xf] %vm491_vm3, %v497_v20 }
 0x1f3   : > { %v502_v21 = vpop.permute.xlu0 %501 }
 0x1f4   : > { %505 = vst.msk [vmem:[#allocation2 + $0x8] sm:$0xf] %vm491_vm3, %v502_v21 }
 0x1f7   : > { %v534_v24 = vld [vmem:[#allocation2 + $0x4] sm:$0xf]  ;;  %v536_v26 = vld [vmem:[#allocation2 + $0xc] sm:$0xf] }
 0x1f8   : > { %1409 = vmatmul.mubr.msk.bf16.vlgmr.msra.gmra.mrb[4].mxu0 %vm520_vm2, %v534_v24 }
 0x1f9   : > { %1419 = vmatpush3.bf16.xpose.msra.mxu0 %v680_v23  ;;  %1420 = vmatprep.mubr.msk.bf16.mxu0 %vm1798_vm0, %v1797_v0 }
 0x1fa   : > { %1430 = vmatprep.subr.bf16.mxu0 %v1797_v0 }
 0x1fb   : > { %v535_v25 = vld [vmem:[#allocation2 + $0x8] sm:$0xf] }
 0x1fc   : > { %1415 = vmatmul.mubr.msk.bf16.vlgmr.msra.gmra.mrb[4].mxu1 %vm520_vm2, %v535_v25 }
 0x1fd   : > { %1426 = vmatprep.mubr.msk.bf16.mxu1 %vm1798_vm0, %v1797_v0  ;;  %1425 = vmatpush3.bf16.msra.mxu1 %v852_v54 }
 0x1fe   : > { %1436 = vmatprep.subr.bf16.mxu1 %v1797_v0 }
 0x200   : > { %1421 = vmatmul.mubr.msk.bf16.vlgmr.msra.gmra.mrb[8].mxu0 %vm520_vm2, %v536_v26  ;;  %v990_v26 = vsel %vm850_vm5, %v532_v22, 0 }
 0x201   : > { %1432 = vmatprep.mubr.msk.bf16.mxu0 %vm1798_vm0, %v1797_v0  ;;  %1431 = vmatpush3.bf16.msra.mxu0 %v898_v7  ;;  %v816_v7 = vld [vmem:[#allocation5 + $0x8] sm:$0xff] }
 0x202   : > { %1442 = vmatprep.subr.bf16.mxu0 %v1797_v0 }
 0x258   : > { %v578_v28 = vpop.f32.mrb[0].mxu1 }
 0x259   : > { %v1404_v29 = vpop.f32.mrb[1].mxu1  ;;  %v726_v30 = vsel %vm520_vm2, %v578_v28, -inf }
 0x25a   : > { %727 = vmax.xlane.f32.xlu1 %v726_v30  ;;  %v581_v31 = vpop.f32.mrb[2].mxu1 }
 0x25b   : > { %v1405_v32 = vpop.f32.mrb[3].mxu1 }
 0x2cb   : > { %v2169_v34 = vpop.f32.mrb[4].mxu0 }
 0x2cc   : > { %v1410_v35 = vpop.f32.mrb[5].mxu0  ;;  %v729_v36 = vsel %vm520_vm2, %v2169_v34, -inf }
 0x2cd   : > { %730 = vmax.xlane.f32.xlu0 %v729_v36  ;;  %v627_v37 = vpop.f32.mrb[6].mxu0 }
 0x2ce   : > { %v1411_v38 = vpop.f32.mrb[7].mxu0 }
 0x2cf   : > { %v2173_v39 = vpop.f32.mrb[4].mxu1 }
 0x2d0   : > { %v1416_v40 = vpop.f32.mrb[5].mxu1  ;;  %v732_v41 = vsel %vm520_vm2, %v2173_v39, -inf }
 0x2d1   : > { %v673_v42 = vpop.f32.mrb[6].mxu1  ;;  %733 = vmax.xlane.f32.xlu0 %v732_v41 }
 0x2d2   : > { %v1417_v43 = vpop.f32.mrb[7].mxu1 }
 0x2d3   : > { %v716_v44 = vpop.f32.mrb[8].mxu0 }
 0x2d4   : > { %v1422_v45 = vpop.f32.mrb[9].mxu0  ;;  %v735_v46 = vsel %vm520_vm2, %v716_v44, -inf }
 0x2d5   : > { %736 = vmax.xlane.f32.xlu1 %v735_v46  ;;  %v719_v47 = vpop.f32.mrb[10].mxu0  ;;  %v787_v45 = vld [vmem:[#allocation4 + $0x8] sm:$0xff] }
 0x2d6   : > { %v1423_v48 = vpop.f32.mrb[11].mxu0 }
 0x2d7   : > { %v788_v48 = vld [vmem:[#allocation4 + $0x10] sm:$0xff] }
 0x2e7   : > { %v728_v50 = vpop.xlane.xlu1 %727 }
 0x2e8   : > { %v2181_v51 = vmax.f32 %v2178_v49, %v728_v50 }
 0x2ea   : > { %v742_v52 = vsub.f32 %v2178_v49, %v2181_v51  ;;  %1040 = vst.msk [vmem:[#allocation3] sm:$0xff] %vm511_vm4, %v2181_v51  ;;  %756 = vperm.xlu0 %1551, %v2181_v51  }
 0x35a   : > { %v731_v56 = vpop.xlane.xlu0 %730 }
 0x35b   : > { %v2194_v57 = vmax.f32 %v2191_v55, %v731_v56 }
 0x35d   : > { %v743_v59 = vsub.f32 %v2191_v55, %v2194_v57  ;;  %1041 = vst.msk [vmem:[#allocation3 + $0x8] sm:$0xff] %vm511_vm4, %v2194_v57  ;;  %761 = vperm.xlu1 %1552, %v2194_v57   ;;  %v789_v55 = vld [vmem:[#allocation4 + $0x18] sm:$0xff] }
 0x35e   : > { %v734_v60 = vpop.xlane.xlu0 %733 }
 0x35f   : > { %v740_v61 = vmax.f32 %v2196_v58, %v734_v60  ;;  %v748_v35 = vmul.f32 1.442695, %v743_v59  ;;  %v786_v60 = vld [vmem:[#allocation4] sm:$0xff] }
 0x361   : > { %v744_v63 = vsub.f32 %v2196_v58, %v740_v61  ;;  %1042 = vst.msk [vmem:[#allocation3 + $0x10] sm:$0xff] %vm511_vm4, %v740_v61  ;;  %766 = vperm.xlu1 %1552, %v740_v61  }
 0x362   : > { %v737_v1 = vpop.xlane.xlu1 %736 }
 0x363   : > { %v741_v2 = vmax.f32 %v2204_v62, %v737_v1  ;;  %v750_v33 = vmul.f32 1.442695, %v744_v63 }
 0x365   : > { %v745_v3 = vsub.f32 %v2204_v62, %v741_v2  ;;  %1043 = vst.msk [vmem:[#allocation3 + $0x18] sm:$0xff] %vm511_vm4, %v741_v2  ;;  %771 = vperm.xlu1 %1552, %v741_v2  }
 0x367   : > { %v752_v36 = vmul.f32 1.442695, %v745_v3 }
 0x369   : > { %v757_v4 = vpop.permute.xlu0 %756 }
 0x36a   : > { %v774_v6 = vsub.f32 %v578_v28, %v757_v4 }
 0x36c   : > { %v778_v8 = vmul.f32 1.442695, %v774_v6 }
 0x36e   : > { %1557 = vpow2.f32 %v778_v8 }
 0x378   : > { %v1558_v10 = vpop.eup %1557 }
 0x379   : > { %v843_v11 = vpack.c.bf16 %v1558_v10, %v1558_v10 }
 0x37b   : > { %1427 = vmatmul.mubr.msk.bf16.vlgmr.msra.gmra.mrb[8].mxu1 %vm520_vm2, %v843_v11 }
 0x37c   : > { %1437 = vmatpush3.bf16.msra.mxu1 %v944_v12  ;;  %1438 = vmatprep.mubr.msk.bf16.mxu1 %vm1798_vm0, %v1797_v0 }
 0x37d   : > { %1448 = vmatprep.subr.bf16.mxu1 %v1797_v0 }
 0x3dc   : > { %v762_v13 = vpop.permute.xlu1 %761 }
 0x3dd   : > { %v775_v14 = vsub.f32 %v2169_v34, %v762_v13  ;;  %v794_v34 = vsel %vm520_vm2, %v1558_v10, 0.0  ;;  %v817_v10 = vld [vmem:[#allocation5 + $0x10] sm:$0xff] }
 0x3df   : > { %v780_v15 = vmul.f32 1.442695, %v775_v14 }
 0x3e0   : > { %v767_v16 = vpop.permute.xlu1 %766 }
 0x3e1   : > { %1559 = vpow2.f32 %v780_v15  ;;  %v776_v17 = vsub.f32 %v2173_v39, %v767_v16 }
 0x3e3   : > { %v782_v18 = vmul.f32 1.442695, %v776_v17 }
 0x3e4   : > { %v772_v19 = vpop.permute.xlu1 %771 }
 0x3e5   : > { %1561 = vpow2.f32 %v782_v18  ;;  %v777_v20 = vsub.f32 %v716_v44, %v772_v19  ;;  %v746_v44 = vmul.f32 1.442695, %v742_v52  ;;  %v818_v18 = vld [vmem:[#allocation5 + $0x18] sm:$0xff] }
 0x3e7   : > { %v784_v21 = vmul.f32 1.442695, %v777_v20 }
 0x3e9   : > { %1563 = vpow2.f32 %v784_v21 }
 0x3ea   : > { %1565 = vpow2.f32 %v750_v33 }
 0x3eb   : > { %v1560_v23 = vpop.eup %1559  ;;  %1567 = vpow2.f32 %v748_v35 }
 0x3ec   : > { %v797_v24 = vsel %vm520_vm2, %v1560_v23, 0.0  ;;  %v844_v25 = vpack.c.bf16 %v1560_v23, %v1560_v23  ;;  %1569 = vpow2.f32 %v752_v36 }
 0x3ed   : > { %798 = vadd.xlane.f32.xlu1 %v797_v24  ;;  %1571 = vpow2.f32 %v746_v44 }
 0x3ee   : > { %1433 = vmatmul.mubr.msk.bf16.vlgmr.msra.gmra.mrb[12].mxu0 %vm520_vm2, %v844_v25 }
 0x3ef   : > { %v1562_v27 = vpop.eup %1561  ;;  %1443 = vmatpush3.bf16.msra.mxu0 %v990_v26  ;;  %1444 = vmatprep.mubr.msk.bf16.mxu0 %vm1798_vm0, %v1797_v0 }
 0x3f0   : > { %v800_v28 = vsel %vm520_vm2, %v1562_v27, 0.0  ;;  %v845_v29 = vpack.c.bf16 %v1562_v27, %v1562_v27 }
 0x3f1   : > { %801 = vadd.xlane.f32.xlu0 %v800_v28 }
 0x3f2   : > { %1439 = vmatmul.mubr.msk.bf16.vlgmr.msra.gmra.mrb[12].mxu1 %vm520_vm2, %v845_v29 }
 0x3f3   : > { %v1564_v30 = vpop.eup %1563  ;;  %1452 = vmatprep.mubr.msk.bf16.mxu1 %vm1798_vm0, %v1797_v0 }
 0x3f4   : > { %v803_v31 = vsel %vm520_vm2, %v1564_v30, 0.0  ;;  %v846_v32 = vpack.c.bf16 %v1564_v30, %v1564_v30  ;;  %v1566_v37 = vpop.eup %1565 }
 0x3f5   : > { %804 = vadd.xlane.f32.xlu1 %v803_v31  ;;  %v1568_v38 = vpop.eup %1567  ;;  %v792_v53 = vmul.f32 %v1566_v37, %v788_v48  ;;  %v1555_v31 = vld [vmem:[%s2324_s5] sm:$0xff]  }
 0x3f6   : > { %1445 = vmatmul.mubr.msk.bf16.vlgmr.msra.gmra.mrb[16].mxu0 %vm520_vm2, %v846_v32  ;;  %v1570_v39 = vpop.eup %1569  ;;  %v791_v46 = vmul.f32 %v1568_v38, %v787_v45  ;;  %1449 = vmatpush3.bf16.msra.mxu1 %v1555_v31 }
 0x3f7   : > { %v793_v57 = vmul.f32 %v1570_v39, %v789_v55  ;;  %v1572_v58 = vpop.eup %1571  ;;  %1450 = vmatprep.subr.bf16.mxu1 %v1797_v0 }
 0x3f8   : > { %v790_v52 = vmul.f32 %v1572_v58, %v786_v60 }
 0x3f9   : > { %795 = vadd.xlane.f32.xlu1 %v794_v34  ;;  %v1556_v34 = vld [vmem:[%s2324_s5 + $0x8] sm:$0xff]  }
 0x3fa   : > { %1451 = vmatpush3.bf16.msra.mxu1 %v1556_v34 }
 0x407   : > { %831 = vperm.xlu0 %1551, %v1566_v37  }
 0x40a   : > { %826 = vperm.xlu1 %1552, %v1568_v38  }
 0x40e   : > { %836 = vperm.xlu1 %1552, %v1570_v39   ;;  %v815_v39 = vld [vmem:[#allocation5] sm:$0xff] }
 0x44e   : > { %v2238_v40 = vpop.f32.mrb[8].mxu1 }
 0x44f   : > { %v1428_v41 = vpop.f32.mrb[9].mxu1 }
 0x450   : > { %v891_v42 = vpop.f32.mrb[10].mxu1 }
 0x451   : > { %v1429_v43 = vpop.f32.mrb[11].mxu1 }
 0x47a   : > { %v799_v47 = vpop.xlane.xlu1 %798 }
 0x47b   : > { %v807_v50 = vadd.f32 %v799_v47, %v791_v46 }
 0x47d   : > { %812 = vst.msk [vmem:[#allocation4 + $0x8] sm:$0xff] %vm511_vm4, %v807_v50 }
 0x47e   : > { %v802_v54 = vpop.xlane.xlu0 %801 }
 0x47f   : > { %v808_v56 = vadd.f32 %v802_v54, %v792_v53 }
 0x481   : > { %813 = vst.msk [vmem:[#allocation4 + $0x10] sm:$0xff] %vm511_vm4, %v808_v56  ;;  %v1359_v56 = vld [vmem:[%s2325_s6] ss:$0 sm:$0xff] }
 0x482   : > { %v805_v59 = vpop.xlane.xlu1 %804 }
 0x483   : > { %v809_v49 = vadd.f32 %v805_v59, %v793_v57 }
 0x484   : > { %v1052_v51 = vld [vmem:[#allocation4 + $0x8] sm:$0xff] }
 0x485   : > { %814 = vst.msk [vmem:[#allocation4 + $0x18] sm:$0xff] %vm511_vm4, %v809_v49  ;;  %1573 = vrcp.f32 %v1052_v51 }
 0x486   : > { %v796_v61 = vpop.xlane.xlu1 %795  ;;  %v832_v11 = vpop.permute.xlu0 %831 }
 0x487   : > { %v806_v62 = vadd.f32 %v796_v61, %v790_v52  ;;  %v841_v16 = vmul.f32 %v832_v11, %v817_v10 }
 0x488   : > { %v1053_v63 = vld [vmem:[#allocation4 + $0x10] sm:$0xff] }
 0x489   : > { %811 = vst.msk [vmem:[#allocation4] sm:$0xff] %vm511_vm4, %v806_v62  ;;  %1575 = vrcp.f32 %v1053_v63 }
 0x48a   : > { %v827_v8 = vpop.permute.xlu1 %826 }
 0x48b   : > { %v840_v9 = vmul.f32 %v827_v8, %v816_v7 }
 0x48c   : > { %v1054_v1 = vld [vmem:[#allocation4 + $0x18] sm:$0xff] }
 0x48d   : > { %1577 = vrcp.f32 %v1054_v1 }
 0x48e   : > { %v837_v19 = vpop.permute.xlu1 %836 }
 0x48f   : > { %v1574_v2 = vpop.eup %1573  ;;  %v842_v24 = vmul.f32 %v837_v19, %v818_v18 }
 0x490   : > { %1066 = vperm.xlu1 %1552, %v1574_v2   ;;  %v1051_v3 = vld [vmem:[#allocation4] sm:$0xff] }
 0x491   : > { %1579 = vrcp.f32 %v1051_v3 }
 0x493   : > { %v1576_v4 = vpop.eup %1575 }
 0x494   : > { %1071 = vperm.xlu1 %1552, %v1576_v4  }
 0x497   : > { %v1578_v5 = vpop.eup %1577 }
 0x498   : > { %821 = vperm.xlu1 %1552, %v1572_v58   ;;  %1076 = vperm.xlu0 %1551, %v1578_v5  }
 0x49b   : > { %v1580_v6 = vpop.eup %1579 }
 0x49c   : > { %1061 = vperm.xlu0 %1551, %v1580_v6  }
 0x4c1   : > { %v934_v12 = vpop.f32.mrb[12].mxu0 }
 0x4c2   : > { %v1033_v13 = vadd.f32 %v934_v12, %v840_v9  ;;  %v1434_v14 = vpop.f32.mrb[13].mxu0 }
 0x4c3   : > { %v937_v15 = vpop.f32.mrb[14].mxu0 }
 0x4c4   : > { %1037 = vst.msk [vmem:[#allocation5 + $0x8] sm:$0xff] %vm520_vm2, %v1033_v13  ;;  %v1435_v17 = vpop.f32.mrb[15].mxu0 }
 0x4c5   : > { %v980_v20 = vpop.f32.mrb[12].mxu1 }
 0x4c6   : > { %v1034_v21 = vadd.f32 %v980_v20, %v841_v16  ;;  %v1440_v22 = vpop.f32.mrb[13].mxu1 }
 0x4c7   : > { %v983_v23 = vpop.f32.mrb[14].mxu1 }
 0x4c8   : > { %1038 = vst.msk [vmem:[#allocation5 + $0x10] sm:$0xff] %vm520_vm2, %v1034_v21  ;;  %v1441_v25 = vpop.f32.mrb[15].mxu1 }
 0x4c9   : > { %v1026_v26 = vpop.f32.mrb[16].mxu0 }
 0x4ca   : > { %v1035_v27 = vadd.f32 %v1026_v26, %v842_v24  ;;  %v1446_v28 = vpop.f32.mrb[17].mxu0 }
 0x4cb   : > { %v1029_v29 = vpop.f32.mrb[18].mxu0  ;;  %v1048_v33 = vld [vmem:[#allocation5 + $0x8] sm:$0xff] }
 0x4cc   : > { %1039 = vst.msk [vmem:[#allocation5 + $0x18] sm:$0xff] %vm520_vm2, %v1035_v27  ;;  %v1447_v30 = vpop.f32.mrb[19].mxu0 }
 0x4cf   : > { %v1049_v36 = vld [vmem:[#allocation5 + $0x10] sm:$0xff] }
 0x4d3   : > { %v1050_v42 = vld [vmem:[#allocation5 + $0x18] sm:$0xff] }
 0x50f   : > { %v1067_v32 = vpop.permute.xlu1 %1066 }
 0x510   : > { %v1080_v35 = vmul.f32 %v1067_v32, %v1048_v33 }
 0x512   : > { %1085 = vrot.lane.b32.xlu1 %v1080_v35, %s1804_s11 }
 0x513   : > { %v1072_v37 = vpop.permute.xlu1 %1071 }
 0x514   : > { %v1081_v38 = vmul.f32 %v1072_v37, %v1049_v36 }
 0x516   : > { %1091 = vrot.lane.b32.xlu0 %v1081_v38, %s1805_s26 }
 0x517   : > { %v1077_v41 = vpop.permute.xlu0 %1076  ;;  %v822_v43 = vpop.permute.xlu1 %821 }
 0x518   : > { %v1082_v44 = vmul.f32 %v1077_v41, %v1050_v42  ;;  %v839_v45 = vmul.f32 %v822_v43, %v815_v39 }
 0x51a   : > { %v1032_v46 = vadd.f32 %v2238_v40, %v839_v45  ;;  %1097 = vrot.lane.b32.xlu1 %v1082_v44, %s1806_s29 }
 0x51b   : > { %v1062_v0 = vpop.permute.xlu0 %1061 }
 0x51c   : > { %1036 = vst.msk [vmem:[#allocation5] sm:$0xff] %vm520_vm2, %v1032_v46 }
 0x523   : > { %v1047_v47 = vld [vmem:[#allocation5] sm:$0xff] }
 0x524   : > { %v1079_v48 = vmul.f32 %v1062_v0, %v1047_v47 }
 0x526   : > { %1083 = vst.msk [vmem:[#allocation6] sm:$0xff] %vm520_vm2, %v1079_v48 }
 0x584   : > { %v1086_v50 = vpop.permute.xlu1 %1085 }
 0x585   : > { %1089 = vst.msk [vmem:[#allocation6] sm:$0xff] %vm1088_vm6, %v1086_v50 }
 0x588   : > { %v1092_v53 = vpop.permute.xlu0 %1091 }
 0x589   : > { %1095 = vst.msk [vmem:[#allocation6] sm:$0xff] %vm1094_vm7, %v1092_v53 }
 0x58c   : > { %v1098_v54 = vpop.permute.xlu1 %1097 }
 0x58d   : > { %1101 = vst.msk [vmem:[#allocation6] sm:$0xff] %vm1100_vm8, %v1098_v54 }
 0x594   : > { %v1102_v40 = vld [vmem:[#allocation6] sm:$0xff] }
 0x595   : > { %v1103_v55 = vpack.c.bf16 %v1102_v40, %v1102_v40 }
 0x597   : > { %1453 = vmatmul.mubr.msk.bf16.vlgmr.msra.gmra.mrb[16].mxu1 %vm445_vm1, %v1103_v55 }
 0x66a   : > { %v1165_v57 = vpop.f32.mrb[16].mxu1 }
 0x66b   : > { %v1166_v58 = vadd.f32 %v1359_v56, %v1165_v57  ;;  %v1454_v59 = vpop.f32.mrb[17].mxu1 }
 0x66c   : > { %v1168_v60 = vpop.f32.mrb[18].mxu1 }
 0x66d   : > { %v1455_v49 = vpop.f32.mrb[19].mxu1  ;;  %1171 = vst.msk [vmem:[%s415_s13] sm:$0xff] %vm445_vm1, %v1166_v58 }
 0x66e   : > { %1712 = shalt.err (!%p1709_p12)
}
 0x66f   : > { %s1713_s23 = scalar_lea.hbm %s2269_s1, 128  ;;  %s1717_s12 = scalar_lea.hbm %s2378_s20, 256 }
 0x670   : > { %p1714_p0 = scmp.ne.s32.totalorder %s2269_s1, %s1713_s23  ;;  %p1718_p11 = scmp.lt.u32.totalorder %s2269_s1, %s2378_s20 }
 0x671   : > { %p1719_p3 = scmp.lt.u32.totalorder %s1717_s12, %s1713_s23  ;;  %p1721_p5 = scmp.lt.u32.totalorder %s1713_s23, %s2269_s1 }
 0x672   : > { %p1715_p2 = pnand %p1714_p0, %p2379_p10 }
 0x673   : > { %p1720_p1 = por %p1719_p3, %p1718_p11 }
 0x674   : > { %p1716_p9 = pneg %p1715_p2 }
 0x675   : > { %p1722_p13 = por %p1721_p5, %p1720_p1 }
 0x677   : > { %p1723_p7 = pnand %p1722_p13, %p1716_p9 }
 0x679   : > { %1726 = shalt.err (!%p1723_p7)
}
 0x67a   : > { %1466 = dma.vmem_to_hbm [thread:$0]  (%p2379_p10), %s2271_s21, 128, %s2269_s1, %s1173_s27  }
 0x67b PF: > { %s2380_s26 = sld [smem:[#allocation20_spill]]  ;;  %s2381_s29 = sld [smem:[#allocation27_spill]] }
 0x67c   : > { %s2382_s18 = sld [smem:[#allocation23_spill]] }
 0x681   : > { %s1199_s10 = sand.u32 1, %s2380_s26   ;;  %p2383_p4 = scmp.ne.s32.totalorder %s2381_s29, 0 }
 0x682   : > { %p2384_p6 = scmp.ge.s32.totalorder %s2382_s18, 2  ;;  %s1200_s19 = scalar_lea.sflag [#allocation9], %s1199_s10 }
 0x684   : > { %p1483_p8 = pnand %p2384_p6, %p2383_p4 }
 0x686   : > { %1764 = dma.done.wait (!%p1483_p8), %s1200_s19, 128  }
 0x687   : > { %1766 = vsyncadd (!%p1483_p8), %s1200_s19, 4294967168  ;;  %s27_s29 = sadd.s32 1, %s2382_s18   ;;  %s2385_s14 = sld [smem:[#allocation21_spill]] }
 0x688   : > { %p24_p12 = scmp.ge.s32.totalorder %s27_s29, 4   ;;  %s2386_s26 = sld [smem:[#allocation25_spill]] }
 0x689   : > { %s2387_s27 = sld [smem:[#allocation22_spill]]  ;;  %s2388_s28 = sld [smem:[#allocation24_spill]] }
 0x68a   : > { %s2389_s24 = smov %s1773_s25  ;;  %26 = sbr.rel (!%p24_p12) target bundleno = 12 (0xc), region = 132 }
 0x68d   : > { %s2390_s25 = smov %s2385_s14 }
 0x691   :  { %1205 = vsyncpa [#allocation8], 1 }
 0x692   :  { %1207 = vsyncpa [#allocation8 + $0x1], 1 }
 0x693   :  { %1208 = vsyncpa [#allocation11], 1 }
 0x694   :  { %1210 = vsyncpa [#allocation11 + $0x1], 1 }
 0x695   :  { %1211 = vsyncpa [#allocation14], 1 }
 0x696   :  { %1212 = vsyncpa [#allocation9], 1 }
 0x697   :  { %1214 = vsyncpa [#allocation9 + $0x1], 1 }

</bundles_post_ra>
